<compile_context>
chip_gen: v6e
topology: v6e:2x2x1
jax: 0.10.0
libtpu: 0.0.40
codegen_flags: <defaults>
</compile_context>

<pallas_src>
import jax
import jax.numpy as jnp
import numpy as np
from jax.experimental import pallas as pl
from jax.experimental.pallas import tpu as pltpu


def _softmax_store(scores, out_ref):
    """Row-wise softmax over the last axis, written to out_ref."""
    m = jnp.max(scores, axis=-1, keepdims=True)
    p = jnp.exp(scores - m)
    denom = jnp.sum(p, axis=-1, keepdims=True)
    inv = pl.reciprocal(denom, approx=True)        # EUP seed (co-issues for free)
    inv = inv * (2.0 - denom * inv)                # one Newton step -> f32 accuracy
    out_ref[...] = (p * inv).astype(out_ref.dtype)


def attention_kernel_flat(hid_ref, encf_ref, uh_ref, m_ref, c_ref, out_ref):
    # hid_ref  : (bb, H)     hidden-state rows for this batch block
    # encf_ref : (bb, T*H)   encoder outputs, lane-dense flattened view
    # uh_ref   : (1, H)      u_h = (W[:, :H])^T v
    # m_ref    : (T*H, T)    block-diagonal matrix: M[t*H + h, t] = u_e[h]
    # c_ref    : (1, 1)      c = v . bias
    # out_ref  : (bb, T)     softmax attention weights over T
    hid = hid_ref[...]                                                          # (bb, H)
    hid_term = jnp.sum(hid * uh_ref[...], axis=-1, keepdims=True) + c_ref[...]  # (bb, 1)
    # Segment-reduce over H on the otherwise-idle MXU: (bb, T*H) @ (T*H, T).
    enc_term = jnp.dot(encf_ref[...], m_ref[...],
                       preferred_element_type=jnp.float32)                      # (bb, T)
    _softmax_store(enc_term + hid_term, out_ref)


def attention_kernel_3d(hid_ref, enc_ref, uh_ref, ue_ref, c_ref, out_ref):
    # Fallback path (H already lane-aligned, or T*H not a multiple of 128).
    # hid_ref : (bb, H), enc_ref : (bb, T, H), uh/ue : (1, H), c : (1,1), out : (bb, T)
    hid = hid_ref[...]                                                           # (bb, H)
    enc = enc_ref[...]                                                           # (bb, T, H)
    hid_term = jnp.sum(hid * uh_ref[...], axis=-1, keepdims=True) + c_ref[...]   # (bb, 1)
    enc_term = jnp.sum(enc * ue_ref[...], axis=-1)                               # (bb, T)
    _softmax_store(enc_term + hid_term, out_ref)


def _vmem_capacity_bytes():
    """Physical VMEM of this chip (64 MiB on v7x, 128 MiB on v5e/v6e)."""
    try:
        cap = getattr(pltpu.get_tpu_info(), "vmem_capacity_bytes", None)
        if cap:
            return int(cap)
    except Exception:
        pass
    return 64 << 20                      # conservative (v7x-sized) fallback


def _pick_batch_block(B, enc_row_bytes, vmem_budget_bytes):
    """Batch rows per grid step.

    * Targets ~2 MiB of encoder data per step (1-4 MiB streaming tiles measure
      ~85% of HBM roofline), clamped so double-buffered blocks stay well inside
      the scoped-VMEM budget.
    * bb is a multiple of 8 (sublane rule) but need NOT divide B: the grid uses
      pl.cdiv(B, bb); the masked tail writeback is safe because rows are
      independent (no cross-row reduction in the kernel).
    * When B allows, bb is capped so the grid has >= 2 steps, letting the
      "parallel" batch axis shard across v7x's two TensorCores and keeping the
      2-deep DMA pipeline fed on v5e/v6e.
    """
    if B <= 8:
        return B if B < 8 else 8
    per_buf_cap = max(vmem_budget_bytes // 8, 1 << 20)      # 2 bufs + headroom
    target = min(2 << 20, per_buf_cap)
    bb = max(8, (target // max(enc_row_bytes, 1)) // 8 * 8)
    if B >= 16:
        half = max(8, (pl.cdiv(B, 2) // 8) * 8)              # guarantee >= 2 steps
        bb = min(bb, half)
    bb = min(bb, (B // 8) * 8)                               # largest multiple of 8 <= B
    return max(bb, 8)


@jax.jit
def attention_forward(hidden, encoder_outputs, W, b, v):
    """hidden: (B, H) f32, encoder_outputs: (B, T, H) f32.
    W: (H, 2H) Linear weight, b: (H,) bias, v: (H,) attention vector.
    Returns attention weights of shape (B, 1, T)."""
    B, T, H = encoder_outputs.shape
    assert hidden.shape == (B, H)

    # Fold v into the concat-Linear weights (valid: no tanh/nonlinearity between
    # self.attn(...) and the bmm with v in the original module).
    u = jnp.dot(v, W)                                        # (2H,)
    u_h = u[:H].reshape(1, H).astype(jnp.float32)
    u_e = u[H:].astype(jnp.float32)                          # (H,)
    c = jnp.dot(v, b).reshape(1, 1).astype(jnp.float32)

    vmem_cap = _vmem_capacity_bytes()
    # Leave ~half of physical VMEM as headroom for double-buffering + compiler
    # scratch: ~32 MiB on v7x, up to 96 MiB on the 128 MiB parts (v5e/v6e).
    vmem_budget = int(min(vmem_cap // 2, 96 << 20))

    enc_row_bytes = T * H * 4
    bb = _pick_batch_block(B, enc_row_bytes, vmem_budget)
    grid = (pl.cdiv(B, bb),)

    # Lane-dense path: H not lane-aligned but T*H is, and the block-diagonal
    # matrix stays tiny.  Otherwise fall back to the 3-D elementwise path.
    use_flat = (H % 128 != 0) and ((T * H) % 128 == 0) and (T * H * T * 4 <= (4 << 20))

    # Safety net: make sure the scoped limit covers at least the minimal
    # double-buffered footprint (never binding at realistic sEMG shapes).
    min_footprint = 2 * bb * (enc_row_bytes + 4 * H + 4 * T) + (1 << 20)
    if use_flat:
        min_footprint += T * H * T * 4
    vmem_limit = int(min(max(vmem_budget, min_footprint), vmem_cap))

    cparams = pltpu.CompilerParams(
        dimension_semantics=("parallel",),
        vmem_limit_bytes=vmem_limit,
    )

    if use_flat:
        enc_flat = encoder_outputs.reshape(B, T * H)          # contiguous view
        blk_diag = (jnp.eye(T, dtype=jnp.float32)[:, None, :]
                    * u_e[None, :, None]).reshape(T * H, T)   # M[t*H+h, t] = u_e[h]
        out = pl.pallas_call(
            attention_kernel_flat,
            out_shape=jax.ShapeDtypeStruct((B, T), jnp.float32),
            grid_spec=pltpu.PrefetchScalarGridSpec(
                num_scalar_prefetch=0,
                grid=grid,
                in_specs=[
                    pl.BlockSpec((bb, H), lambda i: (i, 0)),        # hidden block
                    pl.BlockSpec((bb, T * H), lambda i: (i, 0)),    # enc (lane-dense)
                    pl.BlockSpec((1, H), lambda i: (0, 0)),         # u_h (broadcast)
                    pl.BlockSpec((T * H, T), lambda i: (0, 0)),     # block-diag u_e
                    pl.BlockSpec((1, 1), lambda i: (0, 0)),         # c   (broadcast)
                ],
                out_specs=pl.BlockSpec((bb, T), lambda i: (i, 0)),
            ),
            compiler_params=cparams,
        )(hidden, enc_flat, u_h, blk_diag, c)
    else:
        out = pl.pallas_call(
            attention_kernel_3d,
            out_shape=jax.ShapeDtypeStruct((B, T), jnp.float32),
            grid_spec=pltpu.PrefetchScalarGridSpec(
                num_scalar_prefetch=0,
                grid=grid,
                in_specs=[
                    pl.BlockSpec((bb, H), lambda i: (i, 0)),        # hidden block
                    pl.BlockSpec((bb, T, H), lambda i: (i, 0, 0)),  # encoder outputs
                    pl.BlockSpec((1, H), lambda i: (0, 0)),         # u_h (broadcast)
                    pl.BlockSpec((1, H), lambda i: (0, 0)),         # u_e (broadcast)
                    pl.BlockSpec((1, 1), lambda i: (0, 0)),         # c   (broadcast)
                ],
                out_specs=pl.BlockSpec((bb, T), lambda i: (i, 0)),
            ),
            compiler_params=cparams,
        )(hidden, encoder_outputs, u_h, u_e.reshape(1, H), c)

    return out[:, None, :]            # (B, 1, T) == F.softmax(...).unsqueeze(1)


def attention_reference(hidden, encoder_outputs, W, b, v):
    """Pure-JAX reference mirroring the PyTorch forward exactly."""
    B, T, H = encoder_outputs.shape
    h = jnp.broadcast_to(hidden[:, None, :], (B, T, H))           # repeat + transpose
    cat = jnp.concatenate([h, encoder_outputs], axis=2)           # (B, T, 2H)
    energy = jnp.einsum("btk,hk->bth", cat, W) + b                # nn.Linear(2H, H)
    energy = jnp.swapaxes(energy, 1, 2)                           # (B, H, T)
    vv = jnp.broadcast_to(v[None, None, :], (B, 1, H))            # (B, 1, H)
    scores = jnp.einsum("bih,bht->bit", vv, energy)[:, 0, :]      # (B, T)
    return jax.nn.softmax(scores, axis=1)[:, None, :]             # (B, 1, T)


if __name__ == "__main__":
    B, T, H = 2, 8, 32
    key = jax.random.PRNGKey(0)
    k_hid, k_enc, k_w, k_b, k_v = jax.random.split(key, 5)

    # Deterministic synthetic parameters (shapes per nn.Linear(2H, H) + Parameter(H)).
    bound = 1.0 / np.sqrt(2 * H)
    W = jax.random.uniform(k_w, (H, 2 * H), jnp.float32, -bound, bound)   # Linear weight
    b = jax.random.uniform(k_b, (H,), jnp.float32, -bound, bound)         # Linear bias
    v = jax.random.uniform(k_v, (H,), jnp.float32, 0.0, 1.0)              # torch.rand(H)

    hidden = jax.random.normal(k_hid, (B, H), jnp.float32)
    encoder_outputs = jax.random.normal(k_enc, (B, T, H), jnp.float32)

    out = attention_forward(hidden, encoder_outputs, W, b, v)
    out = jax.block_until_ready(out)

    ref = attention_reference(hidden, encoder_outputs, W, b, v)
    assert out.shape == (B, 1, T)
    np.testing.assert_allclose(np.asarray(out), np.asarray(ref), rtol=1e-4, atol=1e-5)

    print("KERNEL_OK")
</pallas_src>

<mosaic_0001>
module attributes {stable_mosaic.version = 11 : i64} {
  func.func @attention_kernel_flat(%arg0: i32, %arg1: memref<2x32xf32, #tpu.memory_space<vmem>>, %arg2: memref<2x256xf32, #tpu.memory_space<vmem>>, %arg3: memref<1x32xf32, #tpu.memory_space<vmem>>, %arg4: memref<256x8xf32, #tpu.memory_space<vmem>>, %arg5: memref<1x1xf32, #tpu.memory_space<vmem>>, %arg6: memref<2x8xf32, #tpu.memory_space<vmem>>) attributes {dimension_semantics = [#tpu.dimension_semantics<parallel>], iteration_bounds = array<i64: 1>, scalar_prefetch = 0 : i64, scratch_operands = 0 : i64, tpu.core_type = #tpu.core_type<tc>, window_params = [{transform_indices = @transform_0, window_bounds = array<i64: 2, 32>}, {transform_indices = @transform_1, window_bounds = array<i64: 2, 256>}, {pipeline_mode = #tpu.pipeline_mode<synchronous>, transform_indices = @transform_2, window_bounds = array<i64: 1, 32>}, {pipeline_mode = #tpu.pipeline_mode<synchronous>, transform_indices = @transform_3, window_bounds = array<i64: 256, 8>}, {pipeline_mode = #tpu.pipeline_mode<synchronous>, transform_indices = @transform_4, window_bounds = array<i64: 1, 1>}, {transform_indices = @transform_5, window_bounds = array<i64: 2, 8>}]} {
    %c0 = arith.constant 0 : index
    %c0_0 = arith.constant 0 : index
    %0 = vector.load %arg1[%c0, %c0_0] : memref<2x32xf32, #tpu.memory_space<vmem>>, vector<2x32xf32>
    %c0_1 = arith.constant 0 : index
    %c0_2 = arith.constant 0 : index
    %1 = vector.load %arg3[%c0_1, %c0_2] : memref<1x32xf32, #tpu.memory_space<vmem>>, vector<1x32xf32>
    %2 = vector.broadcast %1 : vector<1x32xf32> to vector<2x32xf32>
    %3 = arith.mulf %0, %2 : vector<2x32xf32>
    %cst = arith.constant dense<0.000000e+00> : vector<2xf32>
    %4 = vector.multi_reduction <add>, %3, %cst [1] : vector<2x32xf32> to vector<2xf32>
    %5 = vector.shape_cast %4 : vector<2xf32> to vector<2x1xf32>
    %c0_3 = arith.constant 0 : index
    %c0_4 = arith.constant 0 : index
    %6 = vector.load %arg5[%c0_3, %c0_4] : memref<1x1xf32, #tpu.memory_space<vmem>>, vector<1x1xf32>
    %7 = vector.broadcast %6 : vector<1x1xf32> to vector<2x1xf32>
    %8 = arith.addf %5, %7 : vector<2x1xf32>
    %c0_5 = arith.constant 0 : index
    %c0_6 = arith.constant 0 : index
    %9 = vector.load %arg2[%c0_5, %c0_6] : memref<2x256xf32, #tpu.memory_space<vmem>>, vector<2x256xf32>
    %c0_7 = arith.constant 0 : index
    %c0_8 = arith.constant 0 : index
    %10 = vector.load %arg4[%c0_7, %c0_8] : memref<256x8xf32, #tpu.memory_space<vmem>>, vector<256x8xf32>
    %cst_9 = arith.constant dense<0.000000e+00> : vector<2x8xf32>
    %11 = tpu.matmul %9, %10, %cst_9 {dimension_numbers = #tpu.dot_dimension_numbers<[1], [0], [0], [1], [0, 0, 1, 1], [], []>} : vector<2x256xf32>, vector<256x8xf32>, vector<2x8xf32> -> vector<2x8xf32>
    %12 = vector.broadcast %8 : vector<2x1xf32> to vector<2x8xf32>
    %13 = arith.addf %11, %12 : vector<2x8xf32>
    %cst_10 = arith.constant dense<0xFF800000> : vector<2xf32>
    %14 = vector.multi_reduction <maximumf>, %13, %cst_10 [1] : vector<2x8xf32> to vector<2xf32>
    %15 = vector.shape_cast %14 : vector<2xf32> to vector<2x1xf32>
    %16 = vector.broadcast %15 : vector<2x1xf32> to vector<2x8xf32>
    %17 = arith.subf %13, %16 : vector<2x8xf32>
    %18 = math.exp %17 : vector<2x8xf32>
    %cst_11 = arith.constant dense<0.000000e+00> : vector<2xf32>
    %19 = vector.multi_reduction <add>, %18, %cst_11 [1] : vector<2x8xf32> to vector<2xf32>
    %20 = vector.shape_cast %19 : vector<2xf32> to vector<2x1xf32>
    %21 = tpu.reciprocal %20 {approx = true} : vector<2x1xf32> -> vector<2x1xf32>
    %22 = arith.mulf %20, %21 : vector<2x1xf32>
    %cst_12 = arith.constant 2.000000e+00 : f32
    %23 = vector.broadcast %cst_12 : f32 to vector<2x1xf32>
    %24 = arith.subf %23, %22 : vector<2x1xf32>
    %25 = arith.mulf %21, %24 : vector<2x1xf32>
    %26 = vector.broadcast %25 : vector<2x1xf32> to vector<2x8xf32>
    %27 = arith.mulf %18, %26 : vector<2x8xf32>
    %c0_13 = arith.constant 0 : index
    %c0_14 = arith.constant 0 : index
    %28 = vector.load %arg6[%c0_13, %c0_14] : memref<2x8xf32, #tpu.memory_space<vmem>>, vector<2x8xf32>
    tpu.vector_store %arg6[%c0_13, %c0_14], %27 {strides = array<i32>} : memref<2x8xf32, #tpu.memory_space<vmem>>, vector<2x8xf32>,
    return
  }
  func.func @transform_0(%arg0: i32) -> (i32, i32) {
    %c0_i32 = arith.constant 0 : i32
    %c0_i32_0 = arith.constant 0 : i32
    return %arg0, %c0_i32 : i32, i32
  }
  func.func @transform_1(%arg0: i32) -> (i32, i32) {
    %c0_i32 = arith.constant 0 : i32
    %c0_i32_0 = arith.constant 0 : i32
    return %arg0, %c0_i32 : i32, i32
  }
  func.func @transform_2(%arg0: i32) -> (i32, i32) {
    %c0_i32 = arith.constant 0 : i32
    %c0_i32_0 = arith.constant 0 : i32
    %c0_i32_1 = arith.constant 0 : i32
    return %c0_i32, %c0_i32_0 : i32, i32
  }
  func.func @transform_3(%arg0: i32) -> (i32, i32) {
    %c0_i32 = arith.constant 0 : i32
    %c0_i32_0 = arith.constant 0 : i32
    %c0_i32_1 = arith.constant 0 : i32
    return %c0_i32, %c0_i32_0 : i32, i32
  }
  func.func @transform_4(%arg0: i32) -> (i32, i32) {
    %c0_i32 = arith.constant 0 : i32
    %c0_i32_0 = arith.constant 0 : i32
    %c0_i32_1 = arith.constant 0 : i32
    return %c0_i32, %c0_i32_0 : i32, i32
  }
  func.func @transform_5(%arg0: i32) -> (i32, i32) {
    %c0_i32 = arith.constant 0 : i32
    %c0_i32_0 = arith.constant 0 : i32
    return %arg0, %c0_i32 : i32, i32
  }
}

</mosaic_0001>

<bundles_post_ra>
// kernel: attention_forward.1
= control target key start
LH: loop header
LB: loop body
LE: loop exit
PB: predicated region body
PF: predicated region fallthrough
CT: control target
= control target key end

     0   :  { %s406_s0 = inlined_call_operand.vmem [shape: f32[2,32], index: 0, kind: input, shape index: {}]   ;;  %s407_s1 = inlined_call_operand.vmem [shape: f32[2,256], index: 1, kind: input, shape index: {}]   ;;  %s408_s2 = inlined_call_operand.vmem [shape: f32[1,32], index: 2, kind: input, shape index: {}]   ;;  %s409_s3 = inlined_call_operand.vmem [shape: f32[256,8], index: 3, kind: input, shape index: {}]   ;;  %s410_s4 = inlined_call_operand.<no memory space> [shape: f32[1,1], index: 4, kind: input, shape index: {}]   ;;  %s411_s5 = inlined_call_operand.hbm [shape: f32[2,8], index: 5, kind: output, shape index: {}]  }
   0x1   :  { %v10_v0 = vstv %s410_s4 }
   0x2   :  { %11 = vst [vmem:[#allocation2] sm:$0x1] %v10_v0 }
   0x3   :  { %v23_v1 = vld [vmem:[%s406_s0] sm:$0x3]  ;;  %vm32_vm0 = vcmask 254976   ;;  %v76_v3 = vld [vmem:[%s409_s3 + $0xf8] sm:$0xff]  ;;  %v75_v6 = vld [vmem:[%s409_s3 + $0xf0] sm:$0xff] }
   0x4   :  { %v193_v2 = vld [vmem:[%s408_s2] ss:$0 sm:$0xff]  ;;  %196 = vmatprep.subr.mxu0 %v76_v3  ;;  %v60_v5 = vld [vmem:[%s409_s3 + $0x78] sm:$0xff]  ;;  %v59_v7 = vld [vmem:[%s409_s3 + $0x70] sm:$0xff] }
   0x5   :  { %v31_v4 = vmul.f32 %v193_v2, %v23_v1  ;;  %197 = vmatpush3.msra.mxu0 %v60_v5  ;;  %v74_v8 = vld [vmem:[%s409_s3 + $0xe8] sm:$0xff]  ;;  %v73_v11 = vld [vmem:[%s409_s3 + $0xe0] sm:$0xff]  ;;  %v72_v13 = vld [vmem:[%s409_s3 + $0xd8] sm:$0xff] }
   0x6   :  { %198 = vmatprep.subr.mxu0 %v75_v6  ;;  %v58_v10 = vld [vmem:[%s409_s3 + $0x68] sm:$0xff]  ;;  %v57_v12 = vld [vmem:[%s409_s3 + $0x60] sm:$0xff]  ;;  %v56_v14 = vld [vmem:[%s409_s3 + $0x58] sm:$0xff] }
   0x7   :  { %v33_v9 = vsel %vm32_vm0, %v31_v4, 0.0  ;;  %199 = vmatpush3.msra.mxu0 %v59_v7  ;;  %v71_v15 = vld [vmem:[%s409_s3 + $0xd0] sm:$0xff]  ;;  %v70_v17 = vld [vmem:[%s409_s3 + $0xc8] sm:$0xff]  ;;  %v69_v20 = vld [vmem:[%s409_s3 + $0xc0] sm:$0xff] }
   0x8   :  { %34 = vadd.xlane.f32.xlu0 %v33_v9  ;;  %200 = vmatprep.subr.mxu0 %v74_v8  ;;  %v55_v16 = vld [vmem:[%s409_s3 + $0x50] sm:$0xff]  ;;  %v54_v18 = vld [vmem:[%s409_s3 + $0x48] sm:$0xff]  ;;  %v195_v19 = vld.sshfl [vmem:[%s407_s1] sm:$0x33 pattern:$0x76325410] }
   0x9   :  { %201 = vmatpush3.msra.mxu0 %v58_v10  ;;  %v90_v21 = vcombine.high %v195_v19, %v195_v19 }
   0xa   :  { %202 = vmatprep.subr.mxu0 %v73_v11 }
   0xb   :  { %203 = vmatpush3.msra.mxu0 %v57_v12 }
   0xc   :  { %204 = vmatprep.subr.mxu0 %v72_v13 }
   0xd   :  { %205 = vmatpush3.msra.mxu0 %v56_v14 }
   0xe   :  { %206 = vmatprep.subr.mxu0 %v71_v15 }
   0xf   :  { %207 = vmatpush3.msra.mxu0 %v55_v16 }
  0x10   :  { %12 = vsyncpa [#allocation4], 0  ;;  %208 = vmatprep.subr.mxu0 %v70_v17  ;;  %v53_v22 = vld [vmem:[%s409_s3 + $0x40] sm:$0xff]  ;;  %v68_v23 = vld [vmem:[%s409_s3 + $0xb8] sm:$0xff]  ;;  %157 = vmatprep.mubr.f32.mxu0 %v90_v21  ;;  %v260_v25 = vmov 0   ;;  %vm163_vm1 = vcmask 58368  }
  0x11   :  { %209 = vmatpush3.msra.mxu0 %v54_v18  ;;  %v52_v24 = vld [vmem:[%s409_s3 + $0x38] sm:$0xff]  ;;  %233 = vset.pattern.permute.xlu0 %v260_v25  ;;  %v67_v26 = vld [vmem:[%s409_s3 + $0xb0] sm:$0xff]  ;;  %v66_v28 = vld [vmem:[%s409_s3 + $0xa8] sm:$0xff] }
  0x12   :  { %210 = vmatprep.subr.mxu0 %v69_v20  ;;  %v51_v27 = vld [vmem:[%s409_s3 + $0x30] sm:$0xff]  ;;  %v50_v29 = vld [vmem:[%s409_s3 + $0x28] sm:$0xff]  ;;  %v65_v30 = vld [vmem:[%s409_s3 + $0xa0] sm:$0xff] }
  0x13   :  { %211 = vmatpush3.msra.mxu0 %v53_v22  ;;  %v49_v31 = vld [vmem:[%s409_s3 + $0x20] sm:$0xff]  ;;  %v64_v32 = vld [vmem:[%s409_s3 + $0x98] sm:$0xff]  ;;  %v63_v34 = vld [vmem:[%s409_s3 + $0x90] sm:$0xff] }
  0x14   :  { %212 = vmatprep.subr.mxu0 %v68_v23  ;;  %v48_v33 = vld [vmem:[%s409_s3 + $0x18] sm:$0xff]  ;;  %v47_v35 = vld [vmem:[%s409_s3 + $0x10] sm:$0xff]  ;;  %v62_v36 = vld [vmem:[%s409_s3 + $0x88] sm:$0xff] }
  0x15   :  { %213 = vmatpush3.msra.mxu0 %v52_v24  ;;  %v46_v37 = vld [vmem:[%s409_s3 + $0x8] sm:$0xff]  ;;  %v61_v38 = vld [vmem:[%s409_s3 + $0x80] sm:$0xff] }
  0x16   :  { %214 = vmatprep.subr.mxu0 %v67_v26  ;;  %v45_v39 = vld [vmem:[%s409_s3] sm:$0xff]  ;;  %s261_s3 = smov [#allocation3]  }
  0x17   :  { %215 = vmatpush3.msra.mxu0 %v51_v27  ;;  %v194_v40 = vld [vmem:[#allocation2] ss:$0 sm:$0xff]  ;;  %s185_s2 = sshll.u32 %s261_s3, 4  ;;  %s186_s2 = int_to_ptr.vmem [resolvable:$true] %s185_s2 }
  0x18   :  { %216 = vmatprep.subr.mxu0 %v66_v28  ;;  %s238_s30 = scalar_lea.vmem %s186_s2, 32  ;;  %p243_p1 = scmp.lt.s32.totalorder %s186_s2, %s186_s2 }
  0x19   :  { %217 = vmatpush3.msra.mxu0 %v50_v29  ;;  %p239_p0 = scmp.ne.s32.totalorder %s186_s2, %s238_s30  ;;  %p244_p2 = scmp.lt.s32.totalorder %s238_s30, %s238_s30 }
  0x1a   :  { %218 = vmatprep.subr.mxu0 %v65_v30 }
  0x1b   :  { %219 = vmatpush3.msra.mxu0 %v49_v31  ;;  %p245_p3 = por %p244_p2, %p243_p1 }
  0x1c   :  { %220 = vmatprep.subr.mxu0 %v64_v32 }
  0x1d   :  { %221 = vmatpush3.msra.mxu0 %v48_v33  ;;  %p246_p4 = pnand %p245_p3, %p239_p0 }
  0x1e   :  { %222 = vmatprep.subr.mxu0 %v63_v34 }
  0x1f   :  { %223 = vmatpush3.msra.mxu0 %v47_v35 }
  0x20   :  { %224 = vmatprep.subr.mxu0 %v62_v36 }
  0x21   :  { %225 = vmatpush3.msra.mxu0 %v46_v37 }
  0x22   :  { %226 = vmatprep.subr.mxu0 %v61_v38 }
  0x23   :  { %227 = vmatpush3.msra.mxu0 %v45_v39 }
  0x24   :  { %158 = vmatmul.mubr.f32.vlgmr.msra.gmra.mxu0 %v195_v19 }
  0x91   :  { %v35_v41 = vpop.xlane.xlu0 %34 }
  0x92   :  { %v43_v42 = vadd.f32 %v194_v40, %v35_v41 }
  0x94   :  { %79 = vperm.xlu0 %233, %v43_v42  }
  0xe4   :  { %v228_v43 = vpop.f32.mrf.mxu0 }
  0xe6   :  { %v229_v44 = vpop.f32.mrf.mxu0 }
  0xe7   :  { %v230_v45 = vadd.f32 %v229_v44, %v228_v43 }
 0x10f   :  { %v80_v46 = vpop.permute.xlu0 %79 }
 0x110   :  { %v160_v47 = vadd.f32 %v230_v45, %v80_v46 }
 0x112   :  { %v164_v48 = vsel %vm163_vm1, %v160_v47, -inf }
 0x113   :  { %165 = vmax.xlane.f32.xlu1 %v164_v48 }
 0x19c   :  { %v166_v49 = vpop.xlane.xlu1 %165 }
 0x19d   :  { %v167_v50 = vsub.f32 %v160_v47, %v166_v49 }
 0x19f   :  { %v168_v51 = vmul.f32 1.442695, %v167_v50 }
 0x1a1   :  { %234 = vpow2.f32 %v168_v51 }
 0x1ae   :  { %v235_v52 = vpop.eup %234 }
 0x1af   :  { %v170_v53 = vsel %vm163_vm1, %v235_v52, 0.0 }
 0x1b0   :  { %171 = vadd.xlane.f32.xlu1 %v170_v53 }
 0x239   :  { %v172_v54 = vpop.xlane.xlu1 %171 }
 0x23a   :  { %236 = vrcp.f32 %v172_v54 }
 0x247   :  { %v237_v55 = vpop.eup %236 }
 0x248   :  { %v174_v56 = vmul.f32 %v237_v55, %v172_v54 }
 0x24a   :  { %v175_v57 = vsub.f32 2.0, %v174_v56 }
 0x24c   :  { %v176_v58 = vmul.f32 %v237_v55, %v175_v57 }
 0x24e   :  { %v177_v59 = vmul.f32 %v235_v52, %v176_v58 }
 0x250   :  { %178 = vst.msk [vmem:[#allocation3] sm:$0x3] %vm163_vm1, %v177_v59 }
 0x251   :  { %249 = shalt.err (!%p246_p4)
}
 0x252   :  { %188 = dma.vmem_to_hbm [thread:$0]  %s186_s2, 32, %s411_s5, [#allocation4]  }
 0x253   :  { %258 = dma.done.wait [#allocation4], 32  }
 0x254   :  { %259 = vsyncadd [#allocation4], 4294967264 }
 0x255   :  { %192 = vsyncpa [#allocation4], 1 }

</bundles_post_ra>
